<compile_context>
chip_gen: v5e
topology: v5e:2x2
jax: 0.10.0
libtpu: 0.0.40
codegen_flags: <defaults>
</compile_context>

<pallas_src>
import functools

import jax
import jax.numpy as jnp
from jax import lax
from jax.experimental import pallas as pl
from jax.experimental.pallas import tpu as pltpu

_LANES = 128
_NEG = -1.0e30  # acts as -inf for logsumexp without generating NaNs


def _round_up(x: int, n: int) -> int:
    return ((x + n - 1) // n) * n


def _circle_loss_kernel(sp_ref, sn_ref, out_ref,
                        mp_ref, sump_ref, mn_ref, sumn_ref,
                        *, last_p: int, rem_p: int, last_n: int, rem_n: int,
                        tiles_per_split: int, m: float, gamma: float,
                        tile_rows: int):
    c = pl.program_id(0)                 # split / core index    ("parallel")
    i = pl.program_id(1)                 # tile within the split ("arbitrary")
    t = c * tiles_per_split + i          # global row-tile index
    tile_elems = tile_rows * _LANES

    @pl.when(i == 0)
    def _init():
        mp_ref[...] = jnp.full_like(mp_ref, _NEG)
        mn_ref[...] = jnp.full_like(mn_ref, _NEG)
        sump_ref[...] = jnp.zeros_like(sump_ref)
        sumn_ref[...] = jnp.zeros_like(sumn_ref)

    def logit_p_fn(sp):
        ap = jnp.maximum(-sp + 1.0 + m, 0.0)          # clamp_min(-sp + 1 + m, 0)
        return -ap * (sp - (1.0 - m)) * gamma

    def logit_n_fn(sn):
        an = jnp.maximum(sn + m, 0.0)                 # clamp_min(sn + m, 0)
        return an * (sn - m) * gamma

    def online_update(logit, m_ref, s_ref):
        # Per-lane online logsumexp update (sublane reductions only; the single
        # cross-lane reduce happens once, in the XLA epilogue).
        tile_max = jnp.max(logit, axis=0, keepdims=True)            # (1, 128)
        m_new = jnp.maximum(m_ref[...], tile_max)
        s_ref[...] = (s_ref[...] * jnp.exp(m_ref[...] - m_new)
                      + jnp.sum(jnp.exp(logit - m_new), axis=0, keepdims=True))
        m_ref[...] = m_new

    def tail_mask(logit, rem):
        # `rem` is a static Python int in [1, tile_elems]; if the tail tile is
        # exactly full, skip the mask entirely (decided at trace time).
        if rem == tile_elems:
            return logit
        row = lax.broadcasted_iota(jnp.int32, logit.shape, 0)
        lane = lax.broadcasted_iota(jnp.int32, logit.shape, 1)
        lidx = row * _LANES + lane                    # local (pid-independent) index
        return jnp.where(lidx < rem, logit, _NEG)

    def process(x_ref, logit_fn, m_ref, s_ref, last, rem):
        @pl.when(t < last)                            # full tiles: unmasked fast path
        def _():
            online_update(logit_fn(x_ref[...].astype(jnp.float32)), m_ref, s_ref)

        @pl.when(t == last)                           # tail tile: mask only if partial
        def _():
            online_update(tail_mask(logit_fn(x_ref[...].astype(jnp.float32)), rem),
                          m_ref, s_ref)
        # t > last: stream exhausted on this step — no compute, and the clamped
        # index_map means no new DMA was issued either.

    process(sp_ref, logit_p_fn, mp_ref, sump_ref, last_p, rem_p)
    process(sn_ref, logit_n_fn, mn_ref, sumn_ref, last_n, rem_n)

    @pl.when(i == pl.num_programs(1) - 1)
    def _finalize():
        # Emit this split's partial accumulators; the (tiny) cross-lane combine
        # + softplus run as an XLA epilogue in the wrapper.
        out_ref[0:1, :] = mp_ref[...]
        out_ref[1:2, :] = sump_ref[...]
        out_ref[2:3, :] = mn_ref[...]
        out_ref[3:4, :] = sumn_ref[...]
        out_ref[4:8, :] = jnp.zeros((4, _LANES), jnp.float32)


def _pad_to_tiles(x: jax.Array, tiles: int, tile_rows: int) -> jax.Array:
    flat = x.reshape(-1)
    total = tiles * tile_rows * _LANES
    flat = jnp.pad(flat, (0, total - flat.size))
    return flat.reshape(tiles * tile_rows, _LANES)


def circle_loss(sp: jax.Array, sn: jax.Array, *, m: float, gamma: float,
                tile_rows: int = 4096, num_splits: int = 2) -> jax.Array:
    """Pallas TPU implementation of CircleLoss.forward(sp, sn) -> scalar loss.

    Precondition: sp.size >= 1 and sn.size >= 1 (matches the meaningful use of
    the PyTorch module; empty streams would make logsumexp -> -inf).
    """
    n_p = int(sp.size)
    n_n = int(sn.size)
    if n_p == 0 or n_n == 0:
        raise ValueError("circle_loss requires at least one positive and one negative score")

    # Sublane granule: f32 needs 8, bf16/f16 need 16, 8-bit types need 32.
    itemsize = min(jnp.dtype(sp.dtype).itemsize, jnp.dtype(sn.dtype).itemsize)
    sub = {4: 8, 2: 16, 1: 32}.get(itemsize, 8)

    rows_max = max(pl.cdiv(n_p, _LANES), pl.cdiv(n_n, _LANES))
    tile_rows = _round_up(min(int(tile_rows), _round_up(rows_max, sub)), sub)
    tile_elems = tile_rows * _LANES

    # Per-stream tile counts (NOT padded to max of the two streams).
    tiles_p = pl.cdiv(n_p, tile_elems)
    tiles_n = pl.cdiv(n_n, tile_elems)
    total_tiles = max(tiles_p, tiles_n)

    num_splits = max(1, min(int(num_splits), total_tiles))
    tiles_per_split = pl.cdiv(total_tiles, num_splits)

    last_p, rem_p = tiles_p - 1, n_p - (tiles_p - 1) * tile_elems
    last_n, rem_n = tiles_n - 1, n_n - (tiles_n - 1) * tile_elems

    # Lane+sublane dense (rows, 128) slabs, padded only to each stream's own tiles.
    sp2 = _pad_to_tiles(sp, tiles_p, tile_rows)
    sn2 = _pad_to_tiles(sn, tiles_n, tile_rows)

    kernel = functools.partial(
        _circle_loss_kernel,
        last_p=last_p, rem_p=rem_p, last_n=last_n, rem_n=rem_n,
        tiles_per_split=tiles_per_split,
        m=float(m), gamma=float(gamma), tile_rows=tile_rows)

    # Clamp the block index to the stream's last real block: once a stream is
    # exhausted the block index stops changing, so no further DMA is issued.
    def sp_map(c, i):
        return (jnp.minimum(c * tiles_per_split + i, last_p), 0)

    def sn_map(c, i):
        return (jnp.minimum(c * tiles_per_split + i, last_n), 0)

    parts = pl.pallas_call(
        kernel,
        out_shape=jax.ShapeDtypeStruct((num_splits * 8, _LANES), jnp.float32),
        grid_spec=pltpu.PrefetchScalarGridSpec(
            num_scalar_prefetch=0,
            grid=(num_splits, tiles_per_split),
            in_specs=[
                pl.BlockSpec((tile_rows, _LANES), sp_map),
                pl.BlockSpec((tile_rows, _LANES), sn_map),
            ],
            out_specs=pl.BlockSpec((8, _LANES), lambda c, i: (c, 0)),
            scratch_shapes=[
                pltpu.VMEM((1, _LANES), jnp.float32),   # running max (p)
                pltpu.VMEM((1, _LANES), jnp.float32),   # running sum (p)
                pltpu.VMEM((1, _LANES), jnp.float32),   # running max (n)
                pltpu.VMEM((1, _LANES), jnp.float32),   # running sum (n)
            ]),
        compiler_params=pltpu.CompilerParams(
            dimension_semantics=("parallel", "arbitrary"),
            vmem_limit_bytes=32 * 1024 * 1024,           # safe on v5e/v6e/v7x
            allow_input_fusion=[True, True],             # fuse the pad/reshape in
        ),
    )(sp2, sn2)

    # Tiny XLA epilogue: combine per-split per-lane (max, sum) partials, then softplus.
    parts = parts.reshape(num_splits, 8, _LANES)
    mp, sump = parts[:, 0, :], parts[:, 1, :]
    mn, sumn = parts[:, 2, :], parts[:, 3, :]

    def lse(m_vec, s_vec):
        gmax = jnp.max(m_vec)
        return gmax + jnp.log(jnp.sum(s_vec * jnp.exp(m_vec - gmax)))

    z = lse(mn, sumn) + lse(mp, sump)
    # Stable softplus (matches nn.Softplus()).
    return jnp.maximum(z, 0.0) + jnp.log1p(jnp.exp(-jnp.abs(z)))


def circle_loss_ref(sp, sn, *, m, gamma):
    """Pure-JAX reference mirroring the PyTorch module, for verification."""
    sp = sp.astype(jnp.float32)
    sn = sn.astype(jnp.float32)
    ap = jnp.maximum(-sp + 1.0 + m, 0.0)
    an = jnp.maximum(sn + m, 0.0)
    logit_p = -ap * (sp - (1.0 - m)) * gamma
    logit_n = an * (sn - m) * gamma
    z = jax.nn.logsumexp(logit_n, axis=0) + jax.nn.logsumexp(logit_p, axis=0)
    return jax.nn.softplus(z)


if __name__ == "__main__":
    m = 0.25
    gamma = 80.0

    key = jax.random.PRNGKey(0)
    kp, kn = jax.random.split(key)
    # sp: within-class similarities, sn: between-class similarities (1-D vectors).
    sp = jax.random.uniform(kp, (8,), dtype=jnp.float32, minval=-1.0, maxval=1.0)
    sn = jax.random.uniform(kn, (16,), dtype=jnp.float32, minval=-1.0, maxval=1.0)

    loss = jax.block_until_ready(circle_loss(sp, sn, m=m, gamma=gamma))
    ref = circle_loss_ref(sp, sn, m=m, gamma=gamma)
    assert jnp.allclose(loss, ref, rtol=1e-5, atol=1e-3), (loss, ref)

    # Multi-tile / per-stream tiling / tail-mask / 2-way split path (f32).
    kp2, kn2 = jax.random.split(jax.random.PRNGKey(1))
    sp_big = jax.random.uniform(kp2, (2000,), dtype=jnp.float32, minval=-1.0, maxval=1.0)
    sn_big = jax.random.uniform(kn2, (700,), dtype=jnp.float32, minval=-1.0, maxval=1.0)
    loss_big = jax.block_until_ready(
        circle_loss(sp_big, sn_big, m=m, gamma=gamma, tile_rows=8))
    ref_big = circle_loss_ref(sp_big, sn_big, m=m, gamma=gamma)
    assert jnp.allclose(loss_big, ref_big, rtol=1e-5, atol=1e-3), (loss_big, ref_big)

    # bf16 inputs (in-kernel f32 cast, tile rounded to the 16-sublane bf16 granule).
    kp3, kn3 = jax.random.split(jax.random.PRNGKey(2))
    sp_bf = jax.random.uniform(kp3, (3000,), dtype=jnp.bfloat16, minval=-1.0, maxval=1.0)
    sn_bf = jax.random.uniform(kn3, (5000,), dtype=jnp.bfloat16, minval=-1.0, maxval=1.0)
    loss_bf = jax.block_until_ready(
        circle_loss(sp_bf, sn_bf, m=m, gamma=gamma, tile_rows=16))
    ref_bf = circle_loss_ref(sp_bf, sn_bf, m=m, gamma=gamma)
    assert jnp.allclose(loss_bf, ref_bf, rtol=1e-4, atol=1e-2), (loss_bf, ref_bf)

    print("KERNEL_OK")
</pallas_src>

<mosaic_0001>
module attributes {stable_mosaic.version = 11 : i64} {
  func.func @_circle_loss_kernel(%arg0: i32, %arg1: i32, %arg2: memref<8x128xf32, #tpu.memory_space<vmem>>, %arg3: memref<8x128xf32, #tpu.memory_space<vmem>>, %arg4: memref<8x128xf32, #tpu.memory_space<vmem>>, %arg5: memref<1x128xf32, #tpu.memory_space<vmem>>, %arg6: memref<1x128xf32, #tpu.memory_space<vmem>>, %arg7: memref<1x128xf32, #tpu.memory_space<vmem>>, %arg8: memref<1x128xf32, #tpu.memory_space<vmem>>) attributes {dimension_semantics = [#tpu.dimension_semantics<parallel>, #tpu.dimension_semantics<arbitrary>], iteration_bounds = array<i64: 1, 1>, scalar_prefetch = 0 : i64, scratch_operands = 4 : i64, tpu.core_type = #tpu.core_type<tc>, window_params = [{transform_indices = @transform_0, window_bounds = array<i64: 8, 128>}, {transform_indices = @transform_1, window_bounds = array<i64: 8, 128>}, {transform_indices = @transform_2, window_bounds = array<i64: 8, 128>}]} {
    %c1_i32 = arith.constant 1 : i32
    %0 = arith.muli %arg0, %c1_i32 : i32
    %1 = arith.addi %0, %arg1 : i32
    %c0_i32 = arith.constant 0 : i32
    %2 = arith.cmpi eq, %arg1, %c0_i32 : i32
    %3 = arith.extui %2 : i1 to i32
    %c0_i32_0 = arith.constant 0 : i32
    %4 = arith.cmpi ne, %3, %c0_i32_0 : i32
    scf.if %4 {
      %cst = arith.constant -1.000000e+30 : f32
      %20 = vector.broadcast %cst : f32 to vector<1x128xf32>
      %c0 = arith.constant 0 : index
      %c0_11 = arith.constant 0 : index
      %21 = vector.load %arg5[%c0, %c0_11] : memref<1x128xf32, #tpu.memory_space<vmem>>, vector<1x128xf32>
      tpu.vector_store %arg5[%c0, %c0_11], %20 {strides = array<i32>} : memref<1x128xf32, #tpu.memory_space<vmem>>, vector<1x128xf32>,
      %cst_12 = arith.constant -1.000000e+30 : f32
      %22 = vector.broadcast %cst_12 : f32 to vector<1x128xf32>
      %c0_13 = arith.constant 0 : index
      %c0_14 = arith.constant 0 : index
      %23 = vector.load %arg7[%c0_13, %c0_14] : memref<1x128xf32, #tpu.memory_space<vmem>>, vector<1x128xf32>
      tpu.vector_store %arg7[%c0_13, %c0_14], %22 {strides = array<i32>} : memref<1x128xf32, #tpu.memory_space<vmem>>, vector<1x128xf32>,
      %cst_15 = arith.constant 0.000000e+00 : f32
      %24 = vector.broadcast %cst_15 : f32 to vector<1x128xf32>
      %c0_16 = arith.constant 0 : index
      %c0_17 = arith.constant 0 : index
      %25 = vector.load %arg6[%c0_16, %c0_17] : memref<1x128xf32, #tpu.memory_space<vmem>>, vector<1x128xf32>
      tpu.vector_store %arg6[%c0_16, %c0_17], %24 {strides = array<i32>} : memref<1x128xf32, #tpu.memory_space<vmem>>, vector<1x128xf32>,
      %cst_18 = arith.constant 0.000000e+00 : f32
      %26 = vector.broadcast %cst_18 : f32 to vector<1x128xf32>
      %c0_19 = arith.constant 0 : index
      %c0_20 = arith.constant 0 : index
      %27 = vector.load %arg8[%c0_19, %c0_20] : memref<1x128xf32, #tpu.memory_space<vmem>>, vector<1x128xf32>
      tpu.vector_store %arg8[%c0_19, %c0_20], %26 {strides = array<i32>} : memref<1x128xf32, #tpu.memory_space<vmem>>, vector<1x128xf32>,
    } else {
    }
    %c0_i32_1 = arith.constant 0 : i32
    %5 = arith.cmpi slt, %1, %c0_i32_1 : i32
    %6 = arith.extui %5 : i1 to i32
    %c0_i32_2 = arith.constant 0 : i32
    %7 = arith.cmpi ne, %6, %c0_i32_2 : i32
    scf.if %7 {
      %c0 = arith.constant 0 : index
      %c0_11 = arith.constant 0 : index
      %20 = vector.load %arg2[%c0, %c0_11] : memref<8x128xf32, #tpu.memory_space<vmem>>, vector<8x128xf32>
      %cst = arith.constant 0.000000e+00 : f32
      %21 = vector.broadcast %cst : f32 to vector<8x128xf32>
      %22 = arith.subf %21, %20 : vector<8x128xf32>
      %cst_12 = arith.constant 1.000000e+00 : f32
      %23 = vector.broadcast %cst_12 : f32 to vector<8x128xf32>
      %24 = arith.addf %22, %23 : vector<8x128xf32>
      %cst_13 = arith.constant 2.500000e-01 : f32
      %25 = vector.broadcast %cst_13 : f32 to vector<8x128xf32>
      %26 = arith.addf %24, %25 : vector<8x128xf32>
      %cst_14 = arith.constant 0.000000e+00 : f32
      %27 = vector.broadcast %cst_14 : f32 to vector<8x128xf32>
      %28 = arith.maximumf %26, %27 : vector<8x128xf32>
      %cst_15 = arith.constant 0.000000e+00 : f32
      %29 = vector.broadcast %cst_15 : f32 to vector<8x128xf32>
      %30 = arith.subf %29, %28 : vector<8x128xf32>
      %cst_16 = arith.constant 7.500000e-01 : f32
      %31 = vector.broadcast %cst_16 : f32 to vector<8x128xf32>
      %32 = arith.subf %20, %31 : vector<8x128xf32>
      %33 = arith.mulf %30, %32 : vector<8x128xf32>
      %cst_17 = arith.constant 8.000000e+01 : f32
      %34 = vector.broadcast %cst_17 : f32 to vector<8x128xf32>
      %35 = arith.mulf %33, %34 : vector<8x128xf32>
      %cst_18 = arith.constant dense<0xFF800000> : vector<128xf32>
      %36 = vector.multi_reduction <maximumf>, %35, %cst_18 [0] : vector<8x128xf32> to vector<128xf32>
      %37 = vector.shape_cast %36 : vector<128xf32> to vector<1x128xf32>
      %c0_19 = arith.constant 0 : index
      %c0_20 = arith.constant 0 : index
      %38 = vector.load %arg5[%c0_19, %c0_20] : memref<1x128xf32, #tpu.memory_space<vmem>>, vector<1x128xf32>
      %39 = arith.maximumf %38, %37 : vector<1x128xf32>
      %c0_21 = arith.constant 0 : index
      %c0_22 = arith.constant 0 : index
      %40 = vector.load %arg6[%c0_21, %c0_22] : memref<1x128xf32, #tpu.memory_space<vmem>>, vector<1x128xf32>
      %c0_23 = arith.constant 0 : index
      %c0_24 = arith.constant 0 : index
      %41 = vector.load %arg5[%c0_23, %c0_24] : memref<1x128xf32, #tpu.memory_space<vmem>>, vector<1x128xf32>
      %42 = arith.subf %41, %39 : vector<1x128xf32>
      %43 = math.exp %42 : vector<1x128xf32>
      %44 = arith.mulf %40, %43 : vector<1x128xf32>
      %45 = vector.broadcast %39 : vector<1x128xf32> to vector<8x128xf32>
      %46 = arith.subf %35, %45 : vector<8x128xf32>
      %47 = math.exp %46 : vector<8x128xf32>
      %cst_25 = arith.constant dense<0.000000e+00> : vector<128xf32>
      %48 = vector.multi_reduction <add>, %47, %cst_25 [0] : vector<8x128xf32> to vector<128xf32>
      %49 = vector.shape_cast %48 : vector<128xf32> to vector<1x128xf32>
      %50 = arith.addf %44, %49 : vector<1x128xf32>
      %c0_26 = arith.constant 0 : index
      %c0_27 = arith.constant 0 : index
      %51 = vector.load %arg6[%c0_26, %c0_27] : memref<1x128xf32, #tpu.memory_space<vmem>>, vector<1x128xf32>
      tpu.vector_store %arg6[%c0_26, %c0_27], %50 {strides = array<i32>} : memref<1x128xf32, #tpu.memory_space<vmem>>, vector<1x128xf32>,
      %c0_28 = arith.constant 0 : index
      %c0_29 = arith.constant 0 : index
      %52 = vector.load %arg5[%c0_28, %c0_29] : memref<1x128xf32, #tpu.memory_space<vmem>>, vector<1x128xf32>
      tpu.vector_store %arg5[%c0_28, %c0_29], %39 {strides = array<i32>} : memref<1x128xf32, #tpu.memory_space<vmem>>, vector<1x128xf32>,
    } else {
    }
    %c0_i32_3 = arith.constant 0 : i32
    %8 = arith.cmpi eq, %1, %c0_i32_3 : i32
    %9 = arith.extui %8 : i1 to i32
    %c0_i32_4 = arith.constant 0 : i32
    %10 = arith.cmpi ne, %9, %c0_i32_4 : i32
    scf.if %10 {
      %c0 = arith.constant 0 : index
      %c0_11 = arith.constant 0 : index
      %20 = vector.load %arg2[%c0, %c0_11] : memref<8x128xf32, #tpu.memory_space<vmem>>, vector<8x128xf32>
      %cst = arith.constant 0.000000e+00 : f32
      %21 = vector.broadcast %cst : f32 to vector<8x128xf32>
      %22 = arith.subf %21, %20 : vector<8x128xf32>
      %cst_12 = arith.constant 1.000000e+00 : f32
      %23 = vector.broadcast %cst_12 : f32 to vector<8x128xf32>
      %24 = arith.addf %22, %23 : vector<8x128xf32>
      %cst_13 = arith.constant 2.500000e-01 : f32
      %25 = vector.broadcast %cst_13 : f32 to vector<8x128xf32>
      %26 = arith.addf %24, %25 : vector<8x128xf32>
      %cst_14 = arith.constant 0.000000e+00 : f32
      %27 = vector.broadcast %cst_14 : f32 to vector<8x128xf32>
      %28 = arith.maximumf %26, %27 : vector<8x128xf32>
      %cst_15 = arith.constant 0.000000e+00 : f32
      %29 = vector.broadcast %cst_15 : f32 to vector<8x128xf32>
      %30 = arith.subf %29, %28 : vector<8x128xf32>
      %cst_16 = arith.constant 7.500000e-01 : f32
      %31 = vector.broadcast %cst_16 : f32 to vector<8x128xf32>
      %32 = arith.subf %20, %31 : vector<8x128xf32>
      %33 = arith.mulf %30, %32 : vector<8x128xf32>
      %cst_17 = arith.constant 8.000000e+01 : f32
      %34 = vector.broadcast %cst_17 : f32 to vector<8x128xf32>
      %35 = arith.mulf %33, %34 : vector<8x128xf32>
      %36 = tpu.iota {dimensions = array<i32: 0>} : vector<8x128xi32>
      %37 = tpu.iota {dimensions = array<i32: 1>} : vector<8x128xi32>
      %c128_i32 = arith.constant 128 : i32
      %38 = vector.broadcast %c128_i32 : i32 to vector<8x128xi32>
      %39 = arith.muli %36, %38 : vector<8x128xi32>
      %40 = arith.addi %39, %37 : vector<8x128xi32>
      %c8_i32 = arith.constant 8 : i32
      %41 = vector.broadcast %c8_i32 : i32 to vector<8x128xi32>
      %42 = arith.cmpi slt, %40, %41 : vector<8x128xi32>
      %cst_18 = arith.constant -1.000000e+30 : f32
      %43 = vector.broadcast %cst_18 : f32 to vector<8x128xf32>
      %44 = arith.select %42, %35, %43 : vector<8x128xi1>, vector<8x128xf32>
      %cst_19 = arith.constant dense<0xFF800000> : vector<128xf32>
      %45 = vector.multi_reduction <maximumf>, %44, %cst_19 [0] : vector<8x128xf32> to vector<128xf32>
      %46 = vector.shape_cast %45 : vector<128xf32> to vector<1x128xf32>
      %c0_20 = arith.constant 0 : index
      %c0_21 = arith.constant 0 : index
      %47 = vector.load %arg5[%c0_20, %c0_21] : memref<1x128xf32, #tpu.memory_space<vmem>>, vector<1x128xf32>
      %48 = arith.maximumf %47, %46 : vector<1x128xf32>
      %c0_22 = arith.constant 0 : index
      %c0_23 = arith.constant 0 : index
      %49 = vector.load %arg6[%c0_22, %c0_23] : memref<1x128xf32, #tpu.memory_space<vmem>>, vector<1x128xf32>
      %c0_24 = arith.constant 0 : index
      %c0_25 = arith.constant 0 : index
      %50 = vector.load %arg5[%c0_24, %c0_25] : memref<1x128xf32, #tpu.memory_space<vmem>>, vector<1x128xf32>
      %51 = arith.subf %50, %48 : vector<1x128xf32>
      %52 = math.exp %51 : vector<1x128xf32>
      %53 = arith.mulf %49, %52 : vector<1x128xf32>
      %54 = vector.broadcast %48 : vector<1x128xf32> to vector<8x128xf32>
      %55 = arith.subf %44, %54 : vector<8x128xf32>
      %56 = math.exp %55 : vector<8x128xf32>
      %cst_26 = arith.constant dense<0.000000e+00> : vector<128xf32>
      %57 = vector.multi_reduction <add>, %56, %cst_26 [0] : vector<8x128xf32> to vector<128xf32>
      %58 = vector.shape_cast %57 : vector<128xf32> to vector<1x128xf32>
      %59 = arith.addf %53, %58 : vector<1x128xf32>
      %c0_27 = arith.constant 0 : index
      %c0_28 = arith.constant 0 : index
      %60 = vector.load %arg6[%c0_27, %c0_28] : memref<1x128xf32, #tpu.memory_space<vmem>>, vector<1x128xf32>
      tpu.vector_store %arg6[%c0_27, %c0_28], %59 {strides = array<i32>} : memref<1x128xf32, #tpu.memory_space<vmem>>, vector<1x128xf32>,
      %c0_29 = arith.constant 0 : index
      %c0_30 = arith.constant 0 : index
      %61 = vector.load %arg5[%c0_29, %c0_30] : memref<1x128xf32, #tpu.memory_space<vmem>>, vector<1x128xf32>
      tpu.vector_store %arg5[%c0_29, %c0_30], %48 {strides = array<i32>} : memref<1x128xf32, #tpu.memory_space<vmem>>, vector<1x128xf32>,
    } else {
    }
    %c0_i32_5 = arith.constant 0 : i32
    %11 = arith.cmpi slt, %1, %c0_i32_5 : i32
    %12 = arith.extui %11 : i1 to i32
    %c0_i32_6 = arith.constant 0 : i32
    %13 = arith.cmpi ne, %12, %c0_i32_6 : i32
    scf.if %13 {
      %c0 = arith.constant 0 : index
      %c0_11 = arith.constant 0 : index
      %20 = vector.load %arg3[%c0, %c0_11] : memref<8x128xf32, #tpu.memory_space<vmem>>, vector<8x128xf32>
      %cst = arith.constant 2.500000e-01 : f32
      %21 = vector.broadcast %cst : f32 to vector<8x128xf32>
      %22 = arith.addf %20, %21 : vector<8x128xf32>
      %cst_12 = arith.constant 0.000000e+00 : f32
      %23 = vector.broadcast %cst_12 : f32 to vector<8x128xf32>
      %24 = arith.maximumf %22, %23 : vector<8x128xf32>
      %cst_13 = arith.constant 2.500000e-01 : f32
      %25 = vector.broadcast %cst_13 : f32 to vector<8x128xf32>
      %26 = arith.subf %20, %25 : vector<8x128xf32>
      %27 = arith.mulf %24, %26 : vector<8x128xf32>
      %cst_14 = arith.constant 8.000000e+01 : f32
      %28 = vector.broadcast %cst_14 : f32 to vector<8x128xf32>
      %29 = arith.mulf %27, %28 : vector<8x128xf32>
      %cst_15 = arith.constant dense<0xFF800000> : vector<128xf32>
      %30 = vector.multi_reduction <maximumf>, %29, %cst_15 [0] : vector<8x128xf32> to vector<128xf32>
      %31 = vector.shape_cast %30 : vector<128xf32> to vector<1x128xf32>
      %c0_16 = arith.constant 0 : index
      %c0_17 = arith.constant 0 : index
      %32 = vector.load %arg7[%c0_16, %c0_17] : memref<1x128xf32, #tpu.memory_space<vmem>>, vector<1x128xf32>
      %33 = arith.maximumf %32, %31 : vector<1x128xf32>
      %c0_18 = arith.constant 0 : index
      %c0_19 = arith.constant 0 : index
      %34 = vector.load %arg8[%c0_18, %c0_19] : memref<1x128xf32, #tpu.memory_space<vmem>>, vector<1x128xf32>
      %c0_20 = arith.constant 0 : index
      %c0_21 = arith.constant 0 : index
      %35 = vector.load %arg7[%c0_20, %c0_21] : memref<1x128xf32, #tpu.memory_space<vmem>>, vector<1x128xf32>
      %36 = arith.subf %35, %33 : vector<1x128xf32>
      %37 = math.exp %36 : vector<1x128xf32>
      %38 = arith.mulf %34, %37 : vector<1x128xf32>
      %39 = vector.broadcast %33 : vector<1x128xf32> to vector<8x128xf32>
      %40 = arith.subf %29, %39 : vector<8x128xf32>
      %41 = math.exp %40 : vector<8x128xf32>
      %cst_22 = arith.constant dense<0.000000e+00> : vector<128xf32>
      %42 = vector.multi_reduction <add>, %41, %cst_22 [0] : vector<8x128xf32> to vector<128xf32>
      %43 = vector.shape_cast %42 : vector<128xf32> to vector<1x128xf32>
      %44 = arith.addf %38, %43 : vector<1x128xf32>
      %c0_23 = arith.constant 0 : index
      %c0_24 = arith.constant 0 : index
      %45 = vector.load %arg8[%c0_23, %c0_24] : memref<1x128xf32, #tpu.memory_space<vmem>>, vector<1x128xf32>
      tpu.vector_store %arg8[%c0_23, %c0_24], %44 {strides = array<i32>} : memref<1x128xf32, #tpu.memory_space<vmem>>, vector<1x128xf32>,
      %c0_25 = arith.constant 0 : index
      %c0_26 = arith.constant 0 : index
      %46 = vector.load %arg7[%c0_25, %c0_26] : memref<1x128xf32, #tpu.memory_space<vmem>>, vector<1x128xf32>
      tpu.vector_store %arg7[%c0_25, %c0_26], %33 {strides = array<i32>} : memref<1x128xf32, #tpu.memory_space<vmem>>, vector<1x128xf32>,
    } else {
    }
    %c0_i32_7 = arith.constant 0 : i32
    %14 = arith.cmpi eq, %1, %c0_i32_7 : i32
    %15 = arith.extui %14 : i1 to i32
    %c0_i32_8 = arith.constant 0 : i32
    %16 = arith.cmpi ne, %15, %c0_i32_8 : i32
    scf.if %16 {
      %c0 = arith.constant 0 : index
      %c0_11 = arith.constant 0 : index
      %20 = vector.load %arg3[%c0, %c0_11] : memref<8x128xf32, #tpu.memory_space<vmem>>, vector<8x128xf32>
      %cst = arith.constant 2.500000e-01 : f32
      %21 = vector.broadcast %cst : f32 to vector<8x128xf32>
      %22 = arith.addf %20, %21 : vector<8x128xf32>
      %cst_12 = arith.constant 0.000000e+00 : f32
      %23 = vector.broadcast %cst_12 : f32 to vector<8x128xf32>
      %24 = arith.maximumf %22, %23 : vector<8x128xf32>
      %cst_13 = arith.constant 2.500000e-01 : f32
      %25 = vector.broadcast %cst_13 : f32 to vector<8x128xf32>
      %26 = arith.subf %20, %25 : vector<8x128xf32>
      %27 = arith.mulf %24, %26 : vector<8x128xf32>
      %cst_14 = arith.constant 8.000000e+01 : f32
      %28 = vector.broadcast %cst_14 : f32 to vector<8x128xf32>
      %29 = arith.mulf %27, %28 : vector<8x128xf32>
      %30 = tpu.iota {dimensions = array<i32: 0>} : vector<8x128xi32>
      %31 = tpu.iota {dimensions = array<i32: 1>} : vector<8x128xi32>
      %c128_i32 = arith.constant 128 : i32
      %32 = vector.broadcast %c128_i32 : i32 to vector<8x128xi32>
      %33 = arith.muli %30, %32 : vector<8x128xi32>
      %34 = arith.addi %33, %31 : vector<8x128xi32>
      %c16_i32 = arith.constant 16 : i32
      %35 = vector.broadcast %c16_i32 : i32 to vector<8x128xi32>
      %36 = arith.cmpi slt, %34, %35 : vector<8x128xi32>
      %cst_15 = arith.constant -1.000000e+30 : f32
      %37 = vector.broadcast %cst_15 : f32 to vector<8x128xf32>
      %38 = arith.select %36, %29, %37 : vector<8x128xi1>, vector<8x128xf32>
      %cst_16 = arith.constant dense<0xFF800000> : vector<128xf32>
      %39 = vector.multi_reduction <maximumf>, %38, %cst_16 [0] : vector<8x128xf32> to vector<128xf32>
      %40 = vector.shape_cast %39 : vector<128xf32> to vector<1x128xf32>
      %c0_17 = arith.constant 0 : index
      %c0_18 = arith.constant 0 : index
      %41 = vector.load %arg7[%c0_17, %c0_18] : memref<1x128xf32, #tpu.memory_space<vmem>>, vector<1x128xf32>
      %42 = arith.maximumf %41, %40 : vector<1x128xf32>
      %c0_19 = arith.constant 0 : index
      %c0_20 = arith.constant 0 : index
      %43 = vector.load %arg8[%c0_19, %c0_20] : memref<1x128xf32, #tpu.memory_space<vmem>>, vector<1x128xf32>
      %c0_21 = arith.constant 0 : index
      %c0_22 = arith.constant 0 : index
      %44 = vector.load %arg7[%c0_21, %c0_22] : memref<1x128xf32, #tpu.memory_space<vmem>>, vector<1x128xf32>
      %45 = arith.subf %44, %42 : vector<1x128xf32>
      %46 = math.exp %45 : vector<1x128xf32>
      %47 = arith.mulf %43, %46 : vector<1x128xf32>
      %48 = vector.broadcast %42 : vector<1x128xf32> to vector<8x128xf32>
      %49 = arith.subf %38, %48 : vector<8x128xf32>
      %50 = math.exp %49 : vector<8x128xf32>
      %cst_23 = arith.constant dense<0.000000e+00> : vector<128xf32>
      %51 = vector.multi_reduction <add>, %50, %cst_23 [0] : vector<8x128xf32> to vector<128xf32>
      %52 = vector.shape_cast %51 : vector<128xf32> to vector<1x128xf32>
      %53 = arith.addf %47, %52 : vector<1x128xf32>
      %c0_24 = arith.constant 0 : index
      %c0_25 = arith.constant 0 : index
      %54 = vector.load %arg8[%c0_24, %c0_25] : memref<1x128xf32, #tpu.memory_space<vmem>>, vector<1x128xf32>
      tpu.vector_store %arg8[%c0_24, %c0_25], %53 {strides = array<i32>} : memref<1x128xf32, #tpu.memory_space<vmem>>, vector<1x128xf32>,
      %c0_26 = arith.constant 0 : index
      %c0_27 = arith.constant 0 : index
      %55 = vector.load %arg7[%c0_26, %c0_27] : memref<1x128xf32, #tpu.memory_space<vmem>>, vector<1x128xf32>
      tpu.vector_store %arg7[%c0_26, %c0_27], %42 {strides = array<i32>} : memref<1x128xf32, #tpu.memory_space<vmem>>, vector<1x128xf32>,
    } else {
    }
    %c0_i32_9 = arith.constant 0 : i32
    %17 = arith.cmpi eq, %arg1, %c0_i32_9 : i32
    %18 = arith.extui %17 : i1 to i32
    %c0_i32_10 = arith.constant 0 : i32
    %19 = arith.cmpi ne, %18, %c0_i32_10 : i32
    scf.if %19 {
      %c0 = arith.constant 0 : index
      %c0_11 = arith.constant 0 : index
      %20 = vector.load %arg5[%c0, %c0_11] : memref<1x128xf32, #tpu.memory_space<vmem>>, vector<1x128xf32>
      %c0_12 = arith.constant 0 : index
      %c0_13 = arith.constant 0 : index
      %21 = vector.load %arg4[%c0_12, %c0_13] : memref<8x128xf32, #tpu.memory_space<vmem>>, vector<1x128xf32>
      tpu.vector_store %arg4[%c0_12, %c0_13], %20 {strides = array<i32>} : memref<8x128xf32, #tpu.memory_space<vmem>>, vector<1x128xf32>,
      %c0_14 = arith.constant 0 : index
      %c0_15 = arith.constant 0 : index
      %22 = vector.load %arg6[%c0_14, %c0_15] : memref<1x128xf32, #tpu.memory_space<vmem>>, vector<1x128xf32>
      %c1 = arith.constant 1 : index
      %c0_16 = arith.constant 0 : index
      %23 = vector.load %arg4[%c1, %c0_16] : memref<8x128xf32, #tpu.memory_space<vmem>>, vector<1x128xf32>
      tpu.vector_store %arg4[%c1, %c0_16], %22 {strides = array<i32>} : memref<8x128xf32, #tpu.memory_space<vmem>>, vector<1x128xf32>,
      %c0_17 = arith.constant 0 : index
      %c0_18 = arith.constant 0 : index
      %24 = vector.load %arg7[%c0_17, %c0_18] : memref<1x128xf32, #tpu.memory_space<vmem>>, vector<1x128xf32>
      %c2 = arith.constant 2 : index
      %c0_19 = arith.constant 0 : index
      %25 = vector.load %arg4[%c2, %c0_19] : memref<8x128xf32, #tpu.memory_space<vmem>>, vector<1x128xf32>
      tpu.vector_store %arg4[%c2, %c0_19], %24 {strides = array<i32>} : memref<8x128xf32, #tpu.memory_space<vmem>>, vector<1x128xf32>,
      %c0_20 = arith.constant 0 : index
      %c0_21 = arith.constant 0 : index
      %26 = vector.load %arg8[%c0_20, %c0_21] : memref<1x128xf32, #tpu.memory_space<vmem>>, vector<1x128xf32>
      %c3 = arith.constant 3 : index
      %c0_22 = arith.constant 0 : index
      %27 = vector.load %arg4[%c3, %c0_22] : memref<8x128xf32, #tpu.memory_space<vmem>>, vector<1x128xf32>
      tpu.vector_store %arg4[%c3, %c0_22], %26 {strides = array<i32>} : memref<8x128xf32, #tpu.memory_space<vmem>>, vector<1x128xf32>,
      %cst = arith.constant 0.000000e+00 : f32
      %28 = vector.broadcast %cst : f32 to vector<4x128xf32>
      %c4 = arith.constant 4 : index
      %c0_23 = arith.constant 0 : index
      %29 = vector.load %arg4[%c4, %c0_23] : memref<8x128xf32, #tpu.memory_space<vmem>>, vector<4x128xf32>
      tpu.vector_store %arg4[%c4, %c0_23], %28 {strides = array<i32>} : memref<8x128xf32, #tpu.memory_space<vmem>>, vector<4x128xf32>,
    } else {
    }
    return
  }
  func.func @transform_0(%arg0: i32, %arg1: i32) -> (i32, i32) {
    %c1_i32 = arith.constant 1 : i32
    %0 = arith.muli %arg0, %c1_i32 : i32
    %1 = arith.addi %0, %arg1 : i32
    %c0_i32 = arith.constant 0 : i32
    %2 = arith.minsi %1, %c0_i32 : i32
    %c0_i32_0 = arith.constant 0 : i32
    %c0_i32_1 = arith.constant 0 : i32
    return %2, %c0_i32_0 : i32, i32
  }
  func.func @transform_1(%arg0: i32, %arg1: i32) -> (i32, i32) {
    %c1_i32 = arith.constant 1 : i32
    %0 = arith.muli %arg0, %c1_i32 : i32
    %1 = arith.addi %0, %arg1 : i32
    %c0_i32 = arith.constant 0 : i32
    %2 = arith.minsi %1, %c0_i32 : i32
    %c0_i32_0 = arith.constant 0 : i32
    %c0_i32_1 = arith.constant 0 : i32
    return %2, %c0_i32_0 : i32, i32
  }
  func.func @transform_2(%arg0: i32, %arg1: i32) -> (i32, i32) {
    %c0_i32 = arith.constant 0 : i32
    %c0_i32_0 = arith.constant 0 : i32
    return %arg0, %c0_i32 : i32, i32
  }
}

</mosaic_0001>

<bundles_post_ra>
// kernel: tpu_custom_call.1
= control target key start
LH: loop header
LB: loop body
LE: loop exit
PB: predicated region body
PF: predicated region fallthrough
CT: control target
= control target key end

     0   :  { %7 = vsyncpa [#allocation7], 0  ;;  %s395_s0 = inlined_call_operand.hbm [shape: f32[8,128], index: 0, kind: input, shape index: {}]   ;;  %s396_s1 = inlined_call_operand.hbm [shape: f32[8,128], index: 1, kind: input, shape index: {}]   ;;  %s397_s2 = inlined_call_operand.hbm [shape: f32[8,128], index: 2, kind: output, shape index: {}]  }
   0x1   :  { %8 = vsyncpa [#allocation10], 0 }
   0x2   :  { %9 = vsyncpa [#allocation8], 0  ;;  %s20_s11 = sshll.u32 %s395_s0, 4  ;;  %s366_s12 = smov [#allocation6]   ;;  %s21_s11 = int_to_ptr.hbm [resolvable:$true] %s20_s11 }
   0x3   :  { %s22_s13 = sshll.u32 %s366_s12, 4  ;;  %s36_s16 = sshll.u32 %s396_s1, 4  ;;  %s23_s13 = int_to_ptr.vmem [resolvable:$true] %s22_s13  ;;  %s37_s16 = int_to_ptr.hbm [resolvable:$true] %s36_s16 }
   0x4   :  { %25 = dma.hbm_to_vmem [thread:$0]  %s21_s11, 128, %s23_s13, [#allocation7]  }
   0x5   :  { %s367_s17 = smov [#allocation9]  }
   0x6   :  { %s38_s18 = sshll.u32 %s367_s17, 4  ;;  %s39_s18 = int_to_ptr.vmem [resolvable:$true] %s38_s18 }
   0x7   :  { %41 = dma.hbm_to_vmem [thread:$0]  %s37_s16, 128, %s39_s18, [#allocation10]  }
   0x8   :  { %360 = dma.done.wait [#allocation7], 128  }
   0x9   :  { %361 = vsyncadd [#allocation7], 4294967168 }
   0xa   :  { %362 = dma.done.wait [#allocation10], 128  }
   0xb   :  { %363 = vsyncadd [#allocation10], 4294967168  ;;  %v119_v0 = vlaneseq  ;;  %v368_v1 = vmov -1e+30   ;;  %v369_v5 = vmov 0.0   ;;  %v110_v6 = vld [vmem:[#allocation6] sm:$0xff] }
   0xc   :  { %62 = vst [vmem:[#allocation4] sm:$0x1] %v368_v1  ;;  %v195_v7 = vld [vmem:[#allocation9] sm:$0xff]  ;;  %v111_v8 = vsub.f32 0.0, %v110_v6  ;;  %v272_v17 = vadd.f32 -0.75, %v110_v6  ;;  %s370_s0 = smov [#allocation11]  }
   0xd   :  { %61 = vst [vmem:[#allocation2] sm:$0x1] %v368_v1  ;;  %v120_v2 = vshrl.u32 %v119_v0, 7  ;;  %v122_v3 = vand.u32 127, %v119_v0  ;;  %v196_v9 = vadd.f32 0.25, %v195_v7  ;;  %v274_v11 = vadd.f32 -0.25, %v195_v7 }
   0xe   :  { %64 = vst [vmem:[#allocation5] sm:$0x1] %v369_v5  ;;  %v112_v12 = vadd.f32 1.0, %v111_v8  ;;  %s254_s1 = sshll.u32 %s370_s0, 4  ;;  %s256_s21 = sshll.u32 %s397_s2, 4  ;;  %s255_s1 = int_to_ptr.vmem [resolvable:$true] %s254_s1  ;;  %s257_s21 = int_to_ptr.hbm [resolvable:$true] %s256_s21 }
   0xf   :  { %v123_v4 = vmul.u32 128, %v120_v2  ;;  %63 = vst [vmem:[#allocation3] sm:$0x1] %v369_v5  ;;  %v197_v13 = vmax.f32 %v196_v9, 0.0 }
  0x10   :  { %248 = vst [vmem:[#allocation11 + $0x4] sm:$0xf] %v369_v5  ;;  %v113_v14 = vadd.f32 0.25, %v112_v12 }
  0x11   :  { %v124_v10 = vadd.s32 %v123_v4, %v122_v3  ;;  %v199_v15 = vmul.f32 %v274_v11, %v197_v13 }
  0x12   :  { %v114_v16 = vmax.f32 %v113_v14, 0.0 }
  0x13   :  { %vm207_vm0 = vcmp.lt.s32.totalorder %v124_v10, 16  ;;  %v200_v18 = vmul.f32 80.0, %v199_v15  ;;  %vm125_vm1 = vcmp.lt.s32.totalorder %v124_v10, 8  ;;  %v215_v31 = vld [vmem:[#allocation4] sm:$0x1] }
  0x14   :  { %v115_v19 = vsub.f32 0.0, %v114_v16  ;;  %v133_v38 = vld [vmem:[#allocation2] sm:$0x1] }
  0x15   :  { %v208_v20 = vsel %vm207_vm0, %v200_v18, -1e+30  ;;  %v217_v60 = vld [vmem:[#allocation5] sm:$0x1] }
  0x16   :  { %v209_v21 = vrot.slane %v208_v20, 4  ;;  %v117_v22 = vmul.f32 %v272_v17, %v115_v19  ;;  %v135_v5 = vld [vmem:[#allocation3] sm:$0x1] }
  0x18   :  { %v210_v23 = vmax.f32 %v208_v20, %v209_v21  ;;  %v118_v24 = vmul.f32 80.0, %v117_v22 }
  0x1a   :  { %v211_v25 = vrot.slane %v210_v23, 2  ;;  %v126_v26 = vsel %vm125_vm1, %v118_v24, -1e+30 }
  0x1b   :  { %v127_v27 = vrot.slane %v126_v26, 4 }
  0x1c   :  { %v212_v28 = vmax.f32 %v210_v23, %v211_v25 }
  0x1d   :  { %v128_v29 = vmax.f32 %v126_v26, %v127_v27 }
  0x1e   :  { %v213_v30 = vrot.slane %v212_v28, 1 }
  0x1f   :  { %v129_v32 = vrot.slane %v128_v29, 2 }
  0x20   :  { %v214_v33 = vmax.f32 %v212_v28, %v213_v30 }
  0x21   :  { %v130_v34 = vmax.f32 %v128_v29, %v129_v32 }
  0x22   :  { %v216_v35 = vmax.f32 %v215_v31, %v214_v33 }
  0x23   :  { %v131_v36 = vrot.slane %v130_v34, 1 }
  0x24   :  { %v223_v37 = vperm.slane %v216_v35, 0  ;;  %236 = vst [vmem:[#allocation4] sm:$0x1] %v216_v35  ;;  %v218_v44 = vsub.f32 %v215_v31, %v216_v35 }
  0x25   :  { %v132_v39 = vmax.f32 %v130_v34, %v131_v36 }
  0x26   :  { %v225_v40 = vsub.f32 %v208_v20, %v223_v37  ;;  %v219_v48 = vmul.f32 1.442695, %v218_v44 }
  0x27   :  { %v134_v41 = vmax.f32 %v133_v38, %v132_v39 }
  0x28   :  { %v226_v42 = vmul.f32 1.442695, %v225_v40 }
  0x29   :  { %v141_v43 = vperm.slane %v134_v41, 0  ;;  %154 = vst [vmem:[#allocation2] sm:$0x1] %v134_v41  ;;  %v136_v50 = vsub.f32 %v133_v38, %v134_v41 }
  0x2a   :  { %280 = vpow2.f32 %v226_v42 }
  0x2b   :  { %v244_v45 = vld [vmem:[#allocation4] sm:$0x1]  ;;  %v143_v46 = vsub.f32 %v126_v26, %v141_v43  ;;  %v137_v54 = vmul.f32 1.442695, %v136_v50 }
  0x2c   :  { %245 = vst [vmem:[#allocation11 + $0x2] sm:$0x1] %v244_v45 }
  0x2d   :  { %v144_v47 = vmul.f32 1.442695, %v143_v46 }
  0x2f   :  { %282 = vpow2.f32 %v144_v47 }
  0x30   :  { %v281_v49 = vpop.eup %280  ;;  %v240_v51 = vld [vmem:[#allocation2] sm:$0x1]  ;;  %284 = vpow2.f32 %v219_v48 }
  0x31   :  { %v228_v52 = vrot.slane %v281_v49, 4  ;;  %241 = vst [vmem:[#allocation11] sm:$0x1] %v240_v51  ;;  %286 = vpow2.f32 %v137_v54 }
  0x33   :  { %v229_v53 = vadd.f32 %v281_v49, %v228_v52 }
  0x35   :  { %v230_v55 = vrot.slane %v229_v53, 2  ;;  %v283_v56 = vpop.eup %282 }
  0x36   :  { %v146_v58 = vrot.slane %v283_v56, 4  ;;  %v285_v59 = vpop.eup %284 }
  0x37   :  { %v231_v57 = vadd.f32 %v230_v55, %v229_v53  ;;  %v221_v63 = vmul.f32 %v285_v59, %v217_v60  ;;  %v287_v4 = vpop.eup %286 }
  0x38   :  { %v147_v62 = vadd.f32 %v283_v56, %v146_v58  ;;  %v139_v7 = vmul.f32 %v287_v4, %v135_v5 }
  0x39   :  { %v232_v61 = vrot.slane %v231_v57, 1 }
  0x3a   :  { %v148_v1 = vrot.slane %v147_v62, 2 }
  0x3b   :  { %v233_v0 = vadd.f32 %v232_v61, %v231_v57 }
  0x3c   :  { %v149_v3 = vadd.f32 %v148_v1, %v147_v62 }
  0x3d   :  { %v234_v2 = vadd.f32 %v233_v0, %v221_v63 }
  0x3e   :  { %v150_v6 = vrot.slane %v149_v3, 1 }
  0x3f   :  { %235 = vst [vmem:[#allocation5] sm:$0x1] %v234_v2 }
  0x40   :  { %v151_v8 = vadd.f32 %v150_v6, %v149_v3 }
  0x42   :  { %v152_v9 = vadd.f32 %v151_v8, %v139_v7 }
  0x44   :  { %153 = vst [vmem:[#allocation3] sm:$0x1] %v152_v9 }
  0x46   :  { %v246_v10 = vld [vmem:[#allocation5] sm:$0x1] }
  0x47   :  { %247 = vst [vmem:[#allocation11 + $0x3] sm:$0x1] %v246_v10 }
  0x4b   :  { %v242_v11 = vld [vmem:[#allocation3] sm:$0x1] }
  0x4c   :  { %243 = vst [vmem:[#allocation11 + $0x1] sm:$0x1] %v242_v11 }
  0x4d   :  { %259 = dma.vmem_to_hbm [thread:$0]  %s255_s1, 128, %s257_s21, [#allocation8]  }
  0x4e   :  { %364 = dma.done.wait [#allocation8], 128  }
  0x4f   :  { %365 = vsyncadd [#allocation8], 4294967168 }
  0x50   :  { %264 = vsyncpa [#allocation7], 1 }
  0x51   :  { %265 = vsyncpa [#allocation10], 1 }
  0x52   :  { %266 = vsyncpa [#allocation8], 1 }

</bundles_post_ra>
